<compile_context>
chip_gen: v7x
topology: tpu7x:2x2x1
jax: 0.10.0
libtpu: 0.0.40
codegen_flags: <defaults>
</compile_context>

<pallas_src>
import functools

import jax
import jax.numpy as jnp
from jax.experimental import pallas as pl
from jax.experimental.pallas import tpu as pltpu


def _round_up(x, m):
    return (x + m - 1) // m * m


def _cdiv(a, b):
    return -(-a // b)


def _vmem_capacity_bytes():
    """Per-TensorCore VMEM capacity; falls back to the smallest (v7x) if unknown."""
    try:
        info = pltpu.get_tpu_info()
        cap = getattr(info, "vmem_capacity_bytes", None)
        if cap:
            return int(cap)
    except Exception:
        pass
    return 64 * 1024 * 1024


def _layernorm(y, gamma, beta, d_hid_real):
    """LayerNorm over the (padded) feature axis.

    Invariant: padded feature columns of y are exactly zero (W2/b2/x are
    zero-padded), so plain sums over the padded width already equal the sums
    over the real width; gamma/beta are zero-padded so padded outputs are 0.
    """
    inv_d = 1.0 / d_hid_real
    mean = jnp.sum(y, axis=-1, keepdims=True) * inv_d
    var = jnp.sum(y * y, axis=-1, keepdims=True) * inv_d - mean * mean
    var = jnp.maximum(var, 0.0)
    return (y - mean) * jax.lax.rsqrt(var + 1e-5) * gamma + beta


# ----------------------------------------------------------------------------------
# Fused kernel: whole d_inner resident, weights grid-invariant (DMA once total).
# Grid: (n_token_tiles,)
# ----------------------------------------------------------------------------------
def ffn_fused_kernel(x_ref, w1_ref, b1_ref, w2_ref, b2_ref, gamma_ref, beta_ref,
                     o_ref, *, d_hid_real):
    x_bf16 = x_ref[...].astype(jnp.bfloat16)
    h = jnp.dot(x_bf16, w1_ref[...], preferred_element_type=jnp.float32)
    h = jnp.maximum(h + b1_ref[...], 0.0)
    y = jnp.dot(h.astype(jnp.bfloat16), w2_ref[...],
                preferred_element_type=jnp.float32)
    # TODO(synk): dropout is identity in eval mode; training-mode RNG dropout not implemented.
    y = y + b2_ref[...] + x_ref[...].astype(jnp.float32)
    o_ref[...] = _layernorm(y, gamma_ref[...], beta_ref[...],
                            d_hid_real).astype(o_ref.dtype)


# ----------------------------------------------------------------------------------
# Streamed kernel: d_inner chunked along grid axis 1; f32 accumulator in VMEM.
# Grid: (n_token_tiles, n_inner_chunks)
# ----------------------------------------------------------------------------------
def ffn_streamed_kernel(x_ref, w1_ref, b1_ref, w2_ref, b2_ref, gamma_ref, beta_ref,
                        o_ref, acc_ref, xbf_ref, *, d_hid_real):
    k = pl.program_id(1)
    nk = pl.num_programs(1)

    # Hoisted x -> bf16 cast: done once per token tile, reused for every k chunk.
    @pl.when(k == 0)
    def _():
        xbf_ref[...] = x_ref[...].astype(jnp.bfloat16)

    h = jnp.dot(xbf_ref[...], w1_ref[...], preferred_element_type=jnp.float32)
    h = jnp.maximum(h + b1_ref[...], 0.0)
    partial = jnp.dot(h.astype(jnp.bfloat16), w2_ref[...],
                      preferred_element_type=jnp.float32)

    # First chunk writes directly (no zero-init + read-modify-write).
    @pl.when(k == 0)
    def _():
        acc_ref[...] = partial

    @pl.when(k > 0)
    def _():
        acc_ref[...] += partial

    @pl.when(k == nk - 1)
    def _():
        # TODO(synk): dropout is identity in eval mode; training-mode RNG dropout not implemented.
        y = acc_ref[...] + b2_ref[...] + x_ref[...].astype(jnp.float32)
        o_ref[...] = _layernorm(y, gamma_ref[...], beta_ref[...],
                                d_hid_real).astype(o_ref.dtype)


# ----------------------------------------------------------------------------------
# Wrapper
# ----------------------------------------------------------------------------------
def positionwise_ffn(x, w1, b1, w2, b2, gamma, beta, *, max_tm=1024, max_tk=None):
    """x: (B, L, d_hid). w1 = W1_pt.T: (d_hid, d_inner), w2 = W2_pt.T: (d_inner, d_hid).

    Weights are cast to bf16 for the MXU; accumulation, residual and LayerNorm run
    in f32. `max_tk` (optional) caps the d_inner chunk size (forces streaming).
    """
    B, L, d_hid = x.shape
    d_inner = w1.shape[1]
    assert w1.shape == (d_hid, d_inner)
    assert w2.shape == (d_inner, d_hid)
    assert b1.shape == (d_inner,) and b2.shape == (d_hid,)
    assert gamma.shape == (d_hid,) and beta.shape == (d_hid,)

    n_tok = B * L
    d_hid_p = _round_up(d_hid, 128)
    d_inner_p = _round_up(d_inner, 128)

    out_dtype = x.dtype
    x_bytes = 4                                  # x staged in f32
    out_bytes = jnp.dtype(out_dtype).itemsize

    # ---------------- VMEM-budget-driven tile selection -----------------------------
    vmem_cap = _vmem_capacity_bytes()
    plan_budget = int(vmem_cap * 0.8)

    def plan(tk, fused):
        if fused:
            # x/out double buffers + f32 y/h temporaries (no acc / bf16 cache needed)
            per_row = d_hid_p * (2 * x_bytes + 2 * out_bytes + 4) + 4 * d_inner_p
        else:
            # x/out double buffers + f32 accumulator + bf16 x cache + h chunk temp
            per_row = d_hid_p * (2 * x_bytes + 2 * out_bytes + 4 + 2) + 4 * tk
        fixed = (2 * 2 * d_hid_p * tk * 2        # W1 + W2 chunks, bf16, double-buffered
                 + 2 * tk * 4                    # b1 chunk
                 + 3 * 2 * d_hid_p * 4           # b2 / gamma / beta
                 + (2 << 20))                    # compiler scratch headroom
        return per_row, fixed

    if max_tk is not None:
        tk_cap = max(128, _round_up(min(max_tk, d_inner_p), 128))
    else:
        tk_cap = d_inner_p
    cands = [tk_cap] + [c for c in (1024, 512, 256, 128) if c < tk_cap]

    min_tm = min(256, _round_up(n_tok, 8))
    tk_eff, fused = cands[-1], cands[-1] == d_inner_p
    tm_max = 8
    for tk in cands:
        f = tk == d_inner_p
        per_row, fixed = plan(tk, f)
        cand_tm = (plan_budget - fixed) // per_row
        if cand_tm >= min_tm:
            tk_eff, fused, tm_max = tk, f, cand_tm
            break
    else:
        per_row, fixed = plan(tk_eff, fused)
        tm_max = max((plan_budget - fixed) // per_row, 8)

    # Balanced token tiling (avoid a nearly-empty last tile); >=2 tiles for v7x cores.
    sub = 8 if fused else 16                     # bf16 x-cache prefers 16-row alignment
    tm_target = max(sub, (min(int(tm_max), max_tm) // sub) * sub)
    tm_cap = min(tm_target, _round_up(n_tok, sub))
    n_tiles_tok = _cdiv(n_tok, tm_cap)
    if n_tok >= 2 * sub:
        n_tiles_tok = max(n_tiles_tok, 2)        # keep both v7x TensorCores busy
    tm_eff = _round_up(_cdiv(n_tok, n_tiles_tok), sub)
    n_tok_p = n_tiles_tok * tm_eff

    d_inner_pad = _round_up(d_inner_p, tk_eff)
    n_tiles_k = d_inner_pad // tk_eff

    # ---------------- pad + cast operands --------------------------------------------
    x2d = jnp.pad(x.reshape(n_tok, d_hid).astype(jnp.float32),
                  ((0, n_tok_p - n_tok), (0, d_hid_p - d_hid)))
    w1_p = jnp.pad(w1, ((0, d_hid_p - d_hid),
                        (0, d_inner_pad - d_inner))).astype(jnp.bfloat16)
    w2_p = jnp.pad(w2, ((0, d_inner_pad - d_inner),
                        (0, d_hid_p - d_hid))).astype(jnp.bfloat16)
    b1_p = jnp.pad(b1.astype(jnp.float32),
                   (0, d_inner_pad - d_inner)).reshape(1, d_inner_pad)
    b2_p = jnp.pad(b2.astype(jnp.float32),
                   (0, d_hid_p - d_hid)).reshape(1, d_hid_p)
    gamma_p = jnp.pad(gamma.astype(jnp.float32),
                      (0, d_hid_p - d_hid)).reshape(1, d_hid_p)
    beta_p = jnp.pad(beta.astype(jnp.float32),
                     (0, d_hid_p - d_hid)).reshape(1, d_hid_p)

    # ---------------- grid spec -------------------------------------------------------
    if fused:
        grid_spec = pltpu.PrefetchScalarGridSpec(
            num_scalar_prefetch=0,
            grid=(n_tiles_tok,),
            in_specs=[
                pl.BlockSpec((tm_eff, d_hid_p), lambda i: (i, 0)),          # x tile
                pl.BlockSpec((d_hid_p, d_inner_pad), lambda i: (0, 0)),     # W1 (invariant)
                pl.BlockSpec((1, d_inner_pad), lambda i: (0, 0)),           # b1
                pl.BlockSpec((d_inner_pad, d_hid_p), lambda i: (0, 0)),     # W2 (invariant)
                pl.BlockSpec((1, d_hid_p), lambda i: (0, 0)),               # b2
                pl.BlockSpec((1, d_hid_p), lambda i: (0, 0)),               # gamma
                pl.BlockSpec((1, d_hid_p), lambda i: (0, 0)),               # beta
            ],
            out_specs=pl.BlockSpec((tm_eff, d_hid_p), lambda i: (i, 0)),
            scratch_shapes=[],
        )
        kernel = functools.partial(ffn_fused_kernel, d_hid_real=d_hid)
        dim_sem = ("parallel",)
        weight_streams = 1
    else:
        grid_spec = pltpu.PrefetchScalarGridSpec(
            num_scalar_prefetch=0,
            grid=(n_tiles_tok, n_tiles_k),
            in_specs=[
                pl.BlockSpec((tm_eff, d_hid_p), lambda i, k: (i, 0)),       # x tile
                pl.BlockSpec((d_hid_p, tk_eff), lambda i, k: (0, k)),       # W1 chunk
                pl.BlockSpec((1, tk_eff), lambda i, k: (0, k)),             # b1 chunk
                pl.BlockSpec((tk_eff, d_hid_p), lambda i, k: (k, 0)),       # W2 chunk
                pl.BlockSpec((1, d_hid_p), lambda i, k: (0, 0)),            # b2
                pl.BlockSpec((1, d_hid_p), lambda i, k: (0, 0)),            # gamma
                pl.BlockSpec((1, d_hid_p), lambda i, k: (0, 0)),            # beta
            ],
            out_specs=pl.BlockSpec((tm_eff, d_hid_p), lambda i, k: (i, 0)),
            scratch_shapes=[
                pltpu.VMEM((tm_eff, d_hid_p), jnp.float32),    # f32 accumulator
                pltpu.VMEM((tm_eff, d_hid_p), jnp.bfloat16),   # hoisted bf16 x cache
            ],
        )
        kernel = functools.partial(ffn_streamed_kernel, d_hid_real=d_hid)
        dim_sem = ("parallel", "arbitrary")
        weight_streams = n_tiles_tok

    w_bytes = (w1_p.size + w2_p.size) * 2
    cost = pl.CostEstimate(
        flops=4 * n_tok_p * d_hid_p * d_inner_pad,
        transcendentals=n_tok_p,
        bytes_accessed=(n_tok_p * d_hid_p * (x_bytes + out_bytes)
                        + w_bytes * weight_streams),
    )

    vmem_limit = int(min(vmem_cap * 0.92, 128 * 1024 * 1024))
    vmem_limit = max(vmem_limit, 32 * 1024 * 1024)

    out = pl.pallas_call(
        kernel,
        out_shape=jax.ShapeDtypeStruct((n_tok_p, d_hid_p), out_dtype),
        grid_spec=grid_spec,
        compiler_params=pltpu.CompilerParams(
            dimension_semantics=dim_sem,
            vmem_limit_bytes=vmem_limit,
        ),
        cost_estimate=cost,
    )(x2d, w1_p, b1_p, w2_p, b2_p, gamma_p, beta_p)

    return out[:n_tok, :d_hid].reshape(B, L, d_hid)


def reference_ffn(x, w1, b1, w2, b2, gamma, beta):
    """Same numerics as the kernel: bf16 matmuls with f32 accumulation,
    f32 residual + LayerNorm (eps=1e-5, biased variance — PyTorch defaults)."""
    xf = x.astype(jnp.float32)
    h = jnp.dot(x.astype(jnp.bfloat16), w1.astype(jnp.bfloat16),
                preferred_element_type=jnp.float32) + b1
    h = jnp.maximum(h, 0.0)
    y = jnp.dot(h.astype(jnp.bfloat16), w2.astype(jnp.bfloat16),
                preferred_element_type=jnp.float32) + b2
    y = y + xf
    mean = jnp.mean(y, axis=-1, keepdims=True)
    var = jnp.mean((y - mean) ** 2, axis=-1, keepdims=True)
    return ((y - mean) * jax.lax.rsqrt(var + 1e-5)) * gamma + beta


def _run_case(key, B, L, d_hid, d_inner, **kwargs):
    kx, kw1, kb1, kw2, kb2, kg, kbt = jax.random.split(key, 7)
    x = jax.random.normal(kx, (B, L, d_hid), dtype=jnp.float32)
    # Parameters stored pre-transposed relative to PyTorch Conv1d(k=1) weights:
    # w1 = W1_pt.T : (d_hid, d_inner), w2 = W2_pt.T : (d_inner, d_hid).
    w1 = jax.random.normal(kw1, (d_hid, d_inner), dtype=jnp.float32) * 0.05
    b1 = jax.random.normal(kb1, (d_inner,), dtype=jnp.float32) * 0.05
    w2 = jax.random.normal(kw2, (d_inner, d_hid), dtype=jnp.float32) * 0.05
    b2 = jax.random.normal(kb2, (d_hid,), dtype=jnp.float32) * 0.05
    gamma = 1.0 + 0.1 * jax.random.normal(kg, (d_hid,), dtype=jnp.float32)
    beta = 0.1 * jax.random.normal(kbt, (d_hid,), dtype=jnp.float32)

    out = jax.block_until_ready(
        positionwise_ffn(x, w1, b1, w2, b2, gamma, beta, **kwargs))
    ref = reference_ffn(x, w1, b1, w2, b2, gamma, beta)
    assert out.shape == (B, L, d_hid)
    err = float(jnp.max(jnp.abs(out - ref)))
    assert jnp.allclose(out, ref, atol=2e-3, rtol=2e-3), f"max abs err = {err}"


if __name__ == "__main__":
    key = jax.random.PRNGKey(0)
    k1, k2 = jax.random.split(key)
    # Fused path (weights resident, grid-invariant): B=2, L=8, d_hid=32, d_inner=64.
    _run_case(k1, B=2, L=8, d_hid=32, d_inner=64)
    # Streamed path (d_inner chunked along the "arbitrary" axis), forced via max_tk.
    _run_case(k2, B=2, L=8, d_hid=32, d_inner=256, max_tk=128)
    print("KERNEL_OK")
</pallas_src>

<mosaic_0001>
module attributes {stable_mosaic.version = 11 : i64} {
  func.func @ffn_fused_kernel(%arg0: i32, %arg1: memref<8x128xf32, #tpu.memory_space<vmem>>, %arg2: memref<128x128xbf16, #tpu.memory_space<vmem>>, %arg3: memref<1x128xf32, #tpu.memory_space<vmem>>, %arg4: memref<128x128xbf16, #tpu.memory_space<vmem>>, %arg5: memref<1x128xf32, #tpu.memory_space<vmem>>, %arg6: memref<1x128xf32, #tpu.memory_space<vmem>>, %arg7: memref<1x128xf32, #tpu.memory_space<vmem>>, %arg8: memref<8x128xf32, #tpu.memory_space<vmem>>) attributes {dimension_semantics = [#tpu.dimension_semantics<parallel>], iteration_bounds = array<i64: 2>, scalar_prefetch = 0 : i64, scratch_operands = 0 : i64, tpu.core_type = #tpu.core_type<tc>, window_params = [{transform_indices = @transform_0, window_bounds = array<i64: 8, 128>}, {pipeline_mode = #tpu.pipeline_mode<synchronous>, transform_indices = @transform_1, window_bounds = array<i64: 128, 128>}, {pipeline_mode = #tpu.pipeline_mode<synchronous>, transform_indices = @transform_2, window_bounds = array<i64: 1, 128>}, {pipeline_mode = #tpu.pipeline_mode<synchronous>, transform_indices = @transform_3, window_bounds = array<i64: 128, 128>}, {pipeline_mode = #tpu.pipeline_mode<synchronous>, transform_indices = @transform_4, window_bounds = array<i64: 1, 128>}, {pipeline_mode = #tpu.pipeline_mode<synchronous>, transform_indices = @transform_5, window_bounds = array<i64: 1, 128>}, {pipeline_mode = #tpu.pipeline_mode<synchronous>, transform_indices = @transform_6, window_bounds = array<i64: 1, 128>}, {transform_indices = @transform_7, window_bounds = array<i64: 8, 128>}]} {
    %c0 = arith.constant 0 : index
    %c0_0 = arith.constant 0 : index
    %0 = vector.load %arg1[%c0, %c0_0] : memref<8x128xf32, #tpu.memory_space<vmem>>, vector<8x128xf32>
    %1 = arith.truncf %0 : vector<8x128xf32> to vector<8x128xbf16>
    %c0_1 = arith.constant 0 : index
    %c0_2 = arith.constant 0 : index
    %2 = vector.load %arg2[%c0_1, %c0_2] : memref<128x128xbf16, #tpu.memory_space<vmem>>, vector<128x128xbf16>
    %cst = arith.constant dense<0.000000e+00> : vector<8x128xf32>
    %3 = tpu.matmul %1, %2, %cst {dimension_numbers = #tpu.dot_dimension_numbers<[1], [0], [0], [1], [0, 0, 1, 1], [], []>} : vector<8x128xbf16>, vector<128x128xbf16>, vector<8x128xf32> -> vector<8x128xf32>
    %c0_3 = arith.constant 0 : index
    %c0_4 = arith.constant 0 : index
    %4 = vector.load %arg3[%c0_3, %c0_4] : memref<1x128xf32, #tpu.memory_space<vmem>>, vector<1x128xf32>
    %5 = vector.broadcast %4 : vector<1x128xf32> to vector<8x128xf32>
    %6 = arith.addf %3, %5 : vector<8x128xf32>
    %cst_5 = arith.constant 0.000000e+00 : f32
    %7 = vector.broadcast %cst_5 : f32 to vector<8x128xf32>
    %8 = arith.maximumf %6, %7 : vector<8x128xf32>
    %9 = arith.truncf %8 : vector<8x128xf32> to vector<8x128xbf16>
    %c0_6 = arith.constant 0 : index
    %c0_7 = arith.constant 0 : index
    %10 = vector.load %arg4[%c0_6, %c0_7] : memref<128x128xbf16, #tpu.memory_space<vmem>>, vector<128x128xbf16>
    %cst_8 = arith.constant dense<0.000000e+00> : vector<8x128xf32>
    %11 = tpu.matmul %9, %10, %cst_8 {dimension_numbers = #tpu.dot_dimension_numbers<[1], [0], [0], [1], [0, 0, 1, 1], [], []>} : vector<8x128xbf16>, vector<128x128xbf16>, vector<8x128xf32> -> vector<8x128xf32>
    %c0_9 = arith.constant 0 : index
    %c0_10 = arith.constant 0 : index
    %12 = vector.load %arg5[%c0_9, %c0_10] : memref<1x128xf32, #tpu.memory_space<vmem>>, vector<1x128xf32>
    %13 = vector.broadcast %12 : vector<1x128xf32> to vector<8x128xf32>
    %14 = arith.addf %11, %13 : vector<8x128xf32>
    %c0_11 = arith.constant 0 : index
    %c0_12 = arith.constant 0 : index
    %15 = vector.load %arg1[%c0_11, %c0_12] : memref<8x128xf32, #tpu.memory_space<vmem>>, vector<8x128xf32>
    %16 = arith.addf %14, %15 : vector<8x128xf32>
    %c0_13 = arith.constant 0 : index
    %c0_14 = arith.constant 0 : index
    %17 = vector.load %arg6[%c0_13, %c0_14] : memref<1x128xf32, #tpu.memory_space<vmem>>, vector<1x128xf32>
    %c0_15 = arith.constant 0 : index
    %c0_16 = arith.constant 0 : index
    %18 = vector.load %arg7[%c0_15, %c0_16] : memref<1x128xf32, #tpu.memory_space<vmem>>, vector<1x128xf32>
    %cst_17 = arith.constant dense<0.000000e+00> : vector<8xf32>
    %19 = vector.multi_reduction <add>, %16, %cst_17 [1] : vector<8x128xf32> to vector<8xf32>
    %20 = vector.shape_cast %19 : vector<8xf32> to vector<8x1xf32>
    %cst_18 = arith.constant 3.125000e-02 : f32
    %21 = vector.broadcast %cst_18 : f32 to vector<8x1xf32>
    %22 = arith.mulf %20, %21 : vector<8x1xf32>
    %23 = arith.mulf %16, %16 : vector<8x128xf32>
    %cst_19 = arith.constant dense<0.000000e+00> : vector<8xf32>
    %24 = vector.multi_reduction <add>, %23, %cst_19 [1] : vector<8x128xf32> to vector<8xf32>
    %25 = vector.shape_cast %24 : vector<8xf32> to vector<8x1xf32>
    %cst_20 = arith.constant 3.125000e-02 : f32
    %26 = vector.broadcast %cst_20 : f32 to vector<8x1xf32>
    %27 = arith.mulf %25, %26 : vector<8x1xf32>
    %28 = arith.mulf %22, %22 : vector<8x1xf32>
    %29 = arith.subf %27, %28 : vector<8x1xf32>
    %cst_21 = arith.constant 0.000000e+00 : f32
    %30 = vector.broadcast %cst_21 : f32 to vector<8x1xf32>
    %31 = arith.maximumf %29, %30 : vector<8x1xf32>
    %32 = vector.broadcast %22 : vector<8x1xf32> to vector<8x128xf32>
    %33 = arith.subf %16, %32 : vector<8x128xf32>
    %cst_22 = arith.constant 9.99999974E-6 : f32
    %34 = vector.broadcast %cst_22 : f32 to vector<8x1xf32>
    %35 = arith.addf %31, %34 : vector<8x1xf32>
    %36 = math.rsqrt %35 : vector<8x1xf32>
    %37 = vector.broadcast %36 : vector<8x1xf32> to vector<8x128xf32>
    %38 = arith.mulf %33, %37 : vector<8x128xf32>
    %39 = vector.broadcast %17 : vector<1x128xf32> to vector<8x128xf32>
    %40 = arith.mulf %38, %39 : vector<8x128xf32>
    %41 = vector.broadcast %18 : vector<1x128xf32> to vector<8x128xf32>
    %42 = arith.addf %40, %41 : vector<8x128xf32>
    %c0_23 = arith.constant 0 : index
    %c0_24 = arith.constant 0 : index
    %43 = vector.load %arg8[%c0_23, %c0_24] : memref<8x128xf32, #tpu.memory_space<vmem>>, vector<8x128xf32>
    tpu.vector_store %arg8[%c0_23, %c0_24], %42 {strides = array<i32>} : memref<8x128xf32, #tpu.memory_space<vmem>>, vector<8x128xf32>,
    return
  }
  func.func @transform_0(%arg0: i32) -> (i32, i32) {
    %c0_i32 = arith.constant 0 : i32
    %c0_i32_0 = arith.constant 0 : i32
    return %arg0, %c0_i32 : i32, i32
  }
  func.func @transform_1(%arg0: i32) -> (i32, i32) {
    %c0_i32 = arith.constant 0 : i32
    %c0_i32_0 = arith.constant 0 : i32
    %c0_i32_1 = arith.constant 0 : i32
    return %c0_i32, %c0_i32_0 : i32, i32
  }
  func.func @transform_2(%arg0: i32) -> (i32, i32) {
    %c0_i32 = arith.constant 0 : i32
    %c0_i32_0 = arith.constant 0 : i32
    %c0_i32_1 = arith.constant 0 : i32
    return %c0_i32, %c0_i32_0 : i32, i32
  }
  func.func @transform_3(%arg0: i32) -> (i32, i32) {
    %c0_i32 = arith.constant 0 : i32
    %c0_i32_0 = arith.constant 0 : i32
    %c0_i32_1 = arith.constant 0 : i32
    return %c0_i32, %c0_i32_0 : i32, i32
  }
  func.func @transform_4(%arg0: i32) -> (i32, i32) {
    %c0_i32 = arith.constant 0 : i32
    %c0_i32_0 = arith.constant 0 : i32
    %c0_i32_1 = arith.constant 0 : i32
    return %c0_i32, %c0_i32_0 : i32, i32
  }
  func.func @transform_5(%arg0: i32) -> (i32, i32) {
    %c0_i32 = arith.constant 0 : i32
    %c0_i32_0 = arith.constant 0 : i32
    %c0_i32_1 = arith.constant 0 : i32
    return %c0_i32, %c0_i32_0 : i32, i32
  }
  func.func @transform_6(%arg0: i32) -> (i32, i32) {
    %c0_i32 = arith.constant 0 : i32
    %c0_i32_0 = arith.constant 0 : i32
    %c0_i32_1 = arith.constant 0 : i32
    return %c0_i32, %c0_i32_0 : i32, i32
  }
  func.func @transform_7(%arg0: i32) -> (i32, i32) {
    %c0_i32 = arith.constant 0 : i32
    %c0_i32_0 = arith.constant 0 : i32
    return %arg0, %c0_i32 : i32, i32
  }
}

</mosaic_0001>

<bundles_post_ra>
// kernel: tpu_custom_call.1
= control target key start
LH: loop header
LB: loop body
LE: loop exit
PB: predicated region body
PF: predicated region fallthrough
CT: control target
= control target key end

     0   :  { %12 = vsyncpa [#allocation3], 0  ;;  %s1322_s0 = inlined_call_operand.hbm [shape: f32[16,128], index: 0, kind: input, shape index: {}]   ;;  %s1323_s1 = inlined_call_operand.hbm [shape: bf16[128,128], index: 1, kind: input, shape index: {}]   ;;  %s1324_s2 = inlined_call_operand.vmem [shape: f32[1,128], index: 2, kind: input, shape index: {}]   ;;  %s1325_s3 = inlined_call_operand.hbm [shape: bf16[128,128], index: 3, kind: input, shape index: {}]   ;;  %s1326_s4 = inlined_call_operand.vmem [shape: f32[1,128], index: 4, kind: input, shape index: {}]   ;;  %s1327_s5 = inlined_call_operand.vmem [shape: f32[1,128], index: 5, kind: input, shape index: {}]   ;;  %s1328_s6 = inlined_call_operand.vmem [shape: f32[1,128], index: 6, kind: input, shape index: {}]   ;;  %s1329_s7 = inlined_call_operand.hbm [shape: f32[16,128], index: 7, kind: output, shape index: {}]  }
   0x1   :  { %14 = vsyncpa [#allocation3 + $0x1], 0 }
   0x2   :  { %15 = vsyncpa [#allocation6], 0 }
   0x3   :  { %16 = vsyncpa [#allocation4], 0 }
   0x4   :  { %18 = vsyncpa [#allocation4 + $0x1], 0  ;;  %s1074_s24 = smov 0   ;;  %s1076_s25 = smov 0  }
   0x5   :  { %s1078_s26 = smov 0   ;;  %s1080_s27 = smov 0  }
   0x6 LB: > { %s1095_s28 = sadd.s32 4294967295, %s1024_s27   ;;  %s685_s29 = sadd.s32 4294967294, %s1024_s27   ;;  %s1024_s27 = sphi %s1080_s27, %s1349_s27   ;;  %s1020_s26 = sphi %s1078_s26, %s1348_s26   ;;  %s1016_s25 = sphi %s1076_s25, %s1347_s25   ;;  %s1012_s24 = sphi %s1074_s24, %s1346_s24  }
   0x7   : > { %p44_p0 = scmp.ne.s32.totalorder %s1016_s25, %s1012_s24  ;;  %p1330_p1 = scmp.eq.s32.totalorder %s1095_s28, 0 }
   0x8   : > { %p200_p3 = scmp.eq.s32.totalorder %s685_s29, 1  ;;  %p686_p5 = scmp.ge.s32.totalorder %s1024_s27, 1 }
   0x9   : > { %p1104_p4 = por %p1330_p1, %p44_p0  ;;  %p207_p7 = scmp.lt.s32.totalorder %s1024_s27, 3 }
   0xa   : > { %p1109_p6 = por %p200_p3, %p44_p0  ;;  %s1026_s10 = smov [#allocation5]  }
   0xb   : > { %s1333_s30 = scalar_select %p1104_p4, 1, 0 }
   0xc   : > { %s1334_s8 = scalar_select %p1109_p6, 1, 0 }
   0xd   : > { %p1114_p8 = pnand %p686_p5, %p207_p7  ;;  %s219_s11 = sshll.u32 %s1026_s10, 4  ;;  %s1118_s11 = int_to_ptr.vmem [resolvable:$true] %s219_s11 }
   0xe   : > { %s1027_s13 = smov [#allocation7]   ;;  %s868_s17 = scalar_lea.hbm %s1323_s1, 1024 }
   0xf   : > { %p791_p9 = pneg %p1114_p8  ;;  %s235_s14 = sshll.u32 %s1027_s13, 4  ;;  %s1129_s14 = int_to_ptr.vmem [resolvable:$true] %s235_s14 }
  0x10   : > { %p869_p12 = scmp.ne.s32.totalorder %s1323_s1, %s868_s17  ;;  %p875_p5 = scmp.lt.u32.totalorder %s868_s17, %s1323_s1 }
  0x11   : > { %p1125_p11 = pnand %p791_p9, %p1330_p1 }
  0x13   : > { %p870_p13 = pneg %p1125_p11 }
  0x15   : > { %p871_p0 = pnand %p870_p13, %p869_p12 }
  0x17   : > { %p872_p3 = pneg %p871_p0 }
  0x19   : > { %p877_p7 = pnand %p875_p5, %p872_p3 }
  0x1b   : > { %880 = shalt.err (!%p877_p7)
}
  0x1c   : > { %s881_s22 = scalar_lea.vmem %s1118_s11, 1024  ;;  %p889_p2 = scmp.lt.s32.totalorder %s1118_s11, %s1118_s11 }
  0x1d   : > { %p882_p9 = scmp.ne.s32.totalorder %s1118_s11, %s881_s22  ;;  %p890_p12 = scmp.lt.s32.totalorder %s881_s22, %s881_s22 }
  0x1f   : > { %p884_p10 = pnand %p882_p9, %p870_p13  ;;  %p891_p0 = por %p890_p12, %p889_p2 }
  0x21   : > { %p885_p1 = pneg %p884_p10 }
  0x23   : > { %p892_p6 = pnand %p891_p0, %p885_p1 }
  0x25   : > { %895 = shalt.err (!%p892_p6)
}
  0x26   : > { %s1028_s23 = smov 64   ;;  %s1029_s29 = smov 4  }
  0x27   : > { %794 = dma.hbm_to_vmem [thread:$0]  (!%p1125_p11), %s1323_s1, 1024, %s1118_s11, [#allocation6], %s1028_s23, %s1028_s23, %s1029_s29  }
  0x28   : > { %s896_s17 = scalar_lea.hbm %s1325_s3, 1024 }
  0x29   : > { %p897_p2 = scmp.ne.s32.totalorder %s1325_s3, %s896_s17  ;;  %p903_p10 = scmp.lt.u32.totalorder %s896_s17, %s1325_s3 }
  0x2b   : > { %p899_p1 = pnand %p897_p2, %p870_p13 }
  0x2d   : > { %p900_p6 = pneg %p899_p1 }
  0x2f   : > { %p905_p3 = pnand %p903_p10, %p900_p6 }
  0x31   : > { %908 = shalt.err (!%p905_p3)
}
  0x32   : > { %s909_s11 = scalar_lea.vmem %s1129_s14, 1024  ;;  %p917_p12 = scmp.lt.s32.totalorder %s1129_s14, %s1129_s14 }
  0x33   : > { %p910_p5 = scmp.ne.s32.totalorder %s1129_s14, %s909_s11  ;;  %p918_p0 = scmp.lt.s32.totalorder %s909_s11, %s909_s11 }
  0x35   : > { %p912_p7 = pnand %p910_p5, %p870_p13  ;;  %p919_p2 = por %p918_p0, %p917_p12 }
  0x37   : > { %p913_p9 = pneg %p912_p7 }
  0x39   : > { %p920_p1 = pnand %p919_p2, %p913_p9 }
  0x3b   : > { %923 = shalt.err (!%p920_p1)
}
  0x3c   : > { %797 = dma.hbm_to_vmem [thread:$0]  (!%p1125_p11), %s1325_s3, 1024, %s1129_s14, [#allocation6], %s1028_s23, %s1028_s23, %s1029_s29  }
  0x3d   : > { %s1184_s13 = sadd.s32 1, %s1024_s27   ;;  %s31_s12 = sadd.s32 1, %s1020_s26 }
  0x3e   : > { %s28_s15 = ssub.s32 %s1024_s27, %s1184_s13  ;;  %p38_p13 = scmp.ne.s32.totalorder %s1020_s26, %s1016_s25 }
  0x3f   : > { %p29_p6 = scmp.eq.s32.totalorder %s28_s15, 0  ;;  %p39_p10 = scmp.eq.s32.totalorder %s1024_s27, 0 }
  0x40   : > { %p1337_p3 = scmp.eq.s32.totalorder %s1095_s28, 1  ;;  %p808_p7 = scmp.lt.s32.totalorder %s1024_s27, 2 }
  0x41   : > { %s1200_s17 = scalar_select %p29_p6, %s1020_s26, %s31_s12  }
  0x42   : > { %p1194_p5 = por %p1337_p3, %p38_p13  ;;  %p40_p9 = por %p39_p10, %p38_p13 }
  0x43   : > { %s258_s18 = sand.u32 1, %s1020_s26   ;;  %s691_s14 = sshll.u32 %s1024_s27, 7 }
  0x44   : > { %s1338_s16 = scalar_select %p1194_p5, 1, 0 }
  0x45   : > { %s690_s19 = sshll.u32 %s258_s18, 3  ;;  %s1207_s20 = scalar_lea.hbm %s1322_s0, %s691_s14 }
  0x46   : > { %s262_s21 = scalar_lea.vmem [#allocation2], %s690_s19  ;;  %p1211_p11 = pnand %p808_p7, %p40_p9 }
  0x47   : > { %s269_s11 = sshll.u32 %s262_s21, 4  ;;  %s259_s10 = scalar_lea.sflag [#allocation3], %s258_s18  ;;  %s1209_s11 = int_to_ptr.vmem [resolvable:$true] %s269_s11 }
  0x48   : > { %s924_s12 = scalar_lea.hbm %s1207_s20, 128  ;;  %p926_p0 = pneg %p1211_p11 }
  0x49   : > { %p925_p12 = scmp.ne.s32.totalorder %s1207_s20, %s924_s12  ;;  %s929_s14 = scalar_lea.hbm %s1322_s0, 256 }
  0x4a   : > { %p930_p13 = scmp.lt.u32.totalorder %s1207_s20, %s1322_s0  ;;  %p931_p6 = scmp.lt.u32.totalorder %s929_s14, %s924_s12 }
  0x4b   : > { %p927_p2 = pnand %p926_p0, %p925_p12  ;;  %p933_p3 = scmp.lt.u32.totalorder %s924_s12, %s1207_s20 }
  0x4c   : > { %p932_p10 = por %p931_p6, %p930_p13 }
  0x4d   : > { %p928_p1 = pneg %p927_p2 }
  0x4e   : > { %p934_p7 = por %p933_p3, %p932_p10 }
  0x50   : > { %p935_p9 = pnand %p934_p7, %p928_p1 }
  0x52   : > { %938 = shalt.err (!%p935_p9)
}
  0x53   : > { %s939_s18 = scalar_lea.vmem %s1209_s11, 128  ;;  %s1030_s21 = smov [#allocation2]  }
  0x54   : > { %p940_p12 = scmp.ne.s32.totalorder %s1209_s11, %s939_s18  ;;  %s944_s15 = sshll.u32 %s1030_s21, 4  ;;  %s945_s15 = int_to_ptr.vmem [resolvable:$false] %s944_s15 }
  0x55   : > { %s946_s19 = scalar_lea.vmem %s945_s15, 256  ;;  %p947_p4 = scmp.lt.s32.totalorder %s1209_s11, %s945_s15 }
  0x56   : > { %p942_p2 = pnand %p940_p12, %p926_p0  ;;  %p948_p13 = scmp.lt.s32.totalorder %s946_s19, %s939_s18 }
  0x58   : > { %p943_p5 = pneg %p942_p2  ;;  %p949_p6 = por %p948_p13, %p947_p4 }
  0x5a   : > { %p950_p10 = pnand %p949_p6, %p943_p5 }
  0x5c   : > { %953 = shalt.err (!%p950_p10)
}
  0x5d   : > { %801 = dma.hbm_to_vmem [thread:$0]  (!%p1211_p11), %s1207_s20, 128, %s1209_s11, %s259_s10  }
  0x5e   : > { %278 = sbr.rel (%p1114_p8) target bundleno = 758 (0x2f6), region = 48  ;;  %s1243_s12 = sand.u32 (!%p1114_p8), 1, %s1016_s25  }
  0x5f   : > { %s693_s14 = sshll.u32 (!%p1114_p8), %s1243_s12, 3  ;;  %s281_s23 = scalar_lea.sflag (!%p1114_p8), [#allocation3], %s1243_s12 }
  0x60   : > { %s1249_s29 = scalar_lea.vmem (!%p1114_p8), [#allocation2], %s693_s14  ;;  %p1340_p4 = scmp.ne.s32.totalorder (!%p1114_p8), %s1333_s30, 0 }
  0x65   : > { %999 = dma.done.wait (%p1340_p4), %s281_s23, 128  }
  0x66   : > { %1001 = vsyncadd (%p1340_p4), %s281_s23, 4294967168  ;;  %p1341_p5 = scmp.eq.s32.totalorder %s1095_s28, 0 }
  0x68   : > { %1003 = dma.done.wait (%p1341_p5), [#allocation6], 2048   ;;  %p1342_p8 = pmov %p1341_p5 }
  0x69   : > { %v1031_v0 = vmov 0.0   ;;  %vm1032_vm0 = vmmov 0   ;;  %v850_v1 = vld [vmem:[#allocation5] sm:$0xff]   ;;  %v851_v2 = vld [vmem:[#allocation5 + $0x8] sm:$0xff]   ;;  %v852_v3 = vld [vmem:[#allocation5 + $0x10] sm:$0xff]   ;;  %s718_s15 = sshll.u32 %s1095_s28, 7 }
  0x6a   : > { %1005 = vsyncadd (%p1342_p8), [#allocation6], 4294965248  ;;  %739 = vmatprep.subr.bf16.mxu0 %v1031_v0  ;;  %755 = vmatprep.mubr.msk.bf16.mxu0 %vm1032_vm0, %v1031_v0  ;;  %v858_v4 = vld [vmem:[#allocation7] sm:$0xff]   ;;  %v853_v5 = vld [vmem:[#allocation5 + $0x18] sm:$0xff]   ;;  %s322_s19 = scalar_lea.vmem [#allocation8], %s693_s14  ;;  %s1278_s9 = scalar_lea.hbm %s1329_s7, %s718_s15 }
  0x6b   : > { %759 = vmatprep.subr.bf16.mxu1 %v1031_v0  ;;  %775 = vmatprep.mubr.msk.bf16.mxu1 %vm1032_vm0, %v1031_v0  ;;  %v859_v6 = vld [vmem:[#allocation7 + $0x8] sm:$0xff]   ;;  %v854_v7 = vld [vmem:[#allocation5 + $0x20] sm:$0xff]   ;;  %v860_v8 = vld [vmem:[#allocation7 + $0x10] sm:$0xff]   ;;  %s596_s23 = sshll.u32 %s322_s19, 4  ;;  %s583_s20 = scalar_lea.sflag [#allocation4], %s1243_s12  ;;  %s1280_s23 = int_to_ptr.vmem [resolvable:$true] %s596_s23 }
  0x6c   : > { %740 = vmatpush3.bf16.msra.mxu0 %v850_v1  ;;  %760 = vmatpush3.bf16.msra.mxu1 %v858_v4  ;;  %v855_v9 = vld [vmem:[#allocation5 + $0x28] sm:$0xff]   ;;  %v861_v10 = vld [vmem:[#allocation7 + $0x18] sm:$0xff]   ;;  %v856_v11 = vld [vmem:[#allocation5 + $0x30] sm:$0xff]   ;;  %s954_s11 = scalar_lea.vmem %s1280_s23, 128  ;;  %p1343_p0 = scmp.ne.s32.totalorder %s1338_s16, 0 }
  0x6d   : > { %741 = vmatprep.subr.bf16.mxu0 %v1031_v0  ;;  %761 = vmatprep.subr.bf16.mxu1 %v1031_v0  ;;  %v862_v12 = vld [vmem:[#allocation7 + $0x20] sm:$0xff]   ;;  %v857_v13 = vld [vmem:[#allocation5 + $0x38] sm:$0xff]   ;;  %v863_v15 = vld [vmem:[#allocation7 + $0x28] sm:$0xff]   ;;  %p955_p11 = scmp.ne.s32.totalorder %s1280_s23, %s954_s11  ;;  %s1033_s28 = smov [#allocation8]  }
  0x6e   : > { %v324_v14 = vld [vmem:[%s1249_s29] sm:$0xff]  ;;  %s958_s14 = sshll.u32 %s1033_s28, 4  ;;  %s959_s14 = int_to_ptr.vmem [resolvable:$false] %s958_s14 }
  0x6f   : > { %v325_v16 = vpack.c.bf16 %v324_v14, %v324_v14  ;;  %v864_v17 = vld [vmem:[#allocation7 + $0x30] sm:$0xff]   ;;  %v865_v18 = vld [vmem:[#allocation7 + $0x38] sm:$0xff]   ;;  %p956_p1 = pnand %p955_p11, %p1343_p0  ;;  %s960_s22 = scalar_lea.vmem %s959_s14, 256 }
  0x70   : > { %742 = vmatpush3.bf16.msra.mxu0 %v851_v2  ;;  %762 = vmatpush3.bf16.msra.mxu1 %v859_v6  ;;  %v697_v19 = vld [vmem:[%s1324_s2] ss:$0 sm:$0xff]  ;;  %p961_p7 = scmp.lt.s32.totalorder %s1280_s23, %s959_s14  ;;  %p962_p9 = scmp.lt.s32.totalorder %s960_s22, %s954_s11 }
  0x71   : > { %743 = vmatprep.subr.bf16.mxu0 %v1031_v0  ;;  %763 = vmatprep.subr.bf16.mxu1 %v1031_v0  ;;  %v706_v27 = vld [vmem:[%s1326_s4] ss:$0 sm:$0xff]  ;;  %p957_p3 = pneg %p956_p1 }
  0x72   : > { %v715_v45 = vld [vmem:[%s1327_s5] ss:$0 sm:$0xff]  ;;  %p963_p12 = por %p962_p9, %p961_p7 }
  0x73   : > { %v716_v47 = vld [vmem:[%s1328_s6] ss:$0 sm:$0xff] }
  0x74   : > { %744 = vmatpush3.bf16.msra.mxu0 %v852_v3  ;;  %764 = vmatpush3.bf16.msra.mxu1 %v860_v8  ;;  %p964_p2 = pnand %p963_p12, %p957_p3 }
  0x75   : > { %745 = vmatprep.subr.bf16.mxu0 %v1031_v0  ;;  %765 = vmatprep.subr.bf16.mxu1 %v1031_v0 }
  0x78   : > { %746 = vmatpush3.bf16.msra.mxu0 %v853_v5  ;;  %766 = vmatpush3.bf16.msra.mxu1 %v861_v10 }
  0x79   : > { %747 = vmatprep.subr.bf16.mxu0 %v1031_v0  ;;  %767 = vmatprep.subr.bf16.mxu1 %v1031_v0 }
  0x7c   : > { %748 = vmatpush3.bf16.msra.mxu0 %v854_v7  ;;  %768 = vmatpush3.bf16.msra.mxu1 %v862_v12 }
  0x7d   : > { %749 = vmatprep.subr.bf16.mxu0 %v1031_v0  ;;  %769 = vmatprep.subr.bf16.mxu1 %v1031_v0 }
  0x80   : > { %750 = vmatpush3.bf16.msra.mxu0 %v855_v9  ;;  %770 = vmatpush3.bf16.msra.mxu1 %v863_v15 }
  0x81   : > { %751 = vmatprep.subr.bf16.mxu0 %v1031_v0  ;;  %771 = vmatprep.subr.bf16.mxu1 %v1031_v0 }
  0x84   : > { %752 = vmatpush3.bf16.msra.mxu0 %v856_v11  ;;  %772 = vmatpush3.bf16.msra.mxu1 %v864_v17 }
  0x85   : > { %753 = vmatprep.subr.bf16.mxu0 %v1031_v0  ;;  %773 = vmatprep.subr.bf16.mxu1 %v1031_v0 }
  0x88   : > { %754 = vmatpush3.bf16.msra.mxu0 %v857_v13  ;;  %774 = vmatpush3.bf16.msra.mxu1 %v865_v18 }
  0x8b   : > { %756 = vmatmul.mubr.bf16.vlgmr.msra.gmra.mrb[0].mxu0 %v325_v16 }
 0x15e   : > { %v431_v20 = vpop.f32.mrb[0].mxu0 }
 0x15f   : > { %v432_v21 = vadd.f32 %v697_v19, %v431_v20  ;;  %v757_v22 = vpop.f32.mrb[1].mxu0 }
 0x160   : > { %v434_v23 = vpop.f32.mrb[2].mxu0 }
 0x161   : > { %v437_v24 = vmax.f32 %v432_v21, 0.0  ;;  %v758_v25 = vpop.f32.mrb[3].mxu0 }
 0x163   : > { %v438_v26 = vpack.c.bf16 %v437_v24, %v437_v24 }
 0x165   : > { %776 = vmatmul.mubr.bf16.vlgmr.msra.gmra.mrb[0].mxu1 %v438_v26 }
 0x238   : > { %v544_v28 = vpop.f32.mrb[0].mxu1 }
 0x239   : > { %v545_v29 = vadd.f32 %v706_v27, %v544_v28  ;;  %v777_v30 = vpop.f32.mrb[1].mxu1 }
 0x23a   : > { %v547_v31 = vpop.f32.mrb[2].mxu1 }
 0x23b   : > { %v550_v32 = vadd.f32 %v545_v29, %v324_v14  ;;  %v778_v33 = vpop.f32.mrb[3].mxu1 }
 0x23d   : > { %553 = vadd.xlane.f32.xlu0 %v550_v32  ;;  %v556_v34 = vmul.f32 %v550_v32, %v550_v32 }
 0x241   : > { %557 = vadd.xlane.f32.xlu0 %v556_v34 }
 0x2ca   : > { %v554_v35 = vpop.xlane.xlu0 %553 }
 0x2cb   : > { %v555_v36 = vmul.f32 0.03125, %v554_v35 }
 0x2cd   : > { %v560_v38 = vmul.f32 %v555_v36, %v555_v36  ;;  %v563_v43 = vsub.f32 %v550_v32, %v555_v36 }
 0x2ce   : > { %v558_v37 = vpop.xlane.xlu0 %557 }
 0x2cf   : > { %v559_v39 = vmul.f32 0.03125, %v558_v37 }
 0x2d1   : > { %v561_v40 = vsub.f32 %v559_v39, %v560_v38 }
 0x2d3   : > { %v562_v41 = vmax.f32 %v561_v40, 0.0 }
 0x2d5   : > { %v564_v42 = vadd.f32 1e-05, %v562_v41 }
 0x2d7   : > { %866 = vrsqrt.f32 %v564_v42 }
 0x2e1   : > { %v867_v44 = vpop.eup %866 }
 0x2e2   : > { %v566_v46 = vmul.f32 %v867_v44, %v563_v43 }
 0x2e4   : > { %v573_v48 = vmul.f32 %v715_v45, %v566_v46 }
 0x2e6   : > { %v580_v49 = vadd.f32 %v716_v47, %v573_v48 }
 0x2e8   : > { %581 = vst [vmem:[%s322_s19] sm:$0xff] %v580_v49 }
 0x2e9   : > { %967 = shalt.err (!%p964_p2)
}
 0x2ea   : > { %s968_s12 = scalar_lea.hbm %s1278_s9, 128  ;;  %s972_s21 = scalar_lea.hbm %s1329_s7, 256 }
 0x2eb   : > { %p969_p13 = scmp.ne.s32.totalorder %s1278_s9, %s968_s12  ;;  %p973_p4 = scmp.lt.u32.totalorder %s1278_s9, %s1329_s7 }
 0x2ec   : > { %p974_p5 = scmp.lt.u32.totalorder %s972_s21, %s968_s12  ;;  %p976_p11 = scmp.lt.u32.totalorder %s968_s12, %s1278_s9 }
 0x2ed   : > { %p970_p6 = pnand %p969_p13, %p1343_p0 }
 0x2ee   : > { %p975_p8 = por %p974_p5, %p973_p4 }
 0x2ef   : > { %p971_p10 = pneg %p970_p6 }
 0x2f0   : > { %p977_p1 = por %p976_p11, %p975_p8 }
 0x2f2   : > { %p978_p3 = pnand %p977_p1, %p971_p10 }
 0x2f4   : > { %981 = shalt.err (!%p978_p3)
}
 0x2f5   : > { %789 = dma.vmem_to_hbm [thread:$0]  (%p1343_p0), %s1280_s23, 128, %s1278_s9, %s583_s20  }
 0x2f6 PF: > { %s608_s29 = sand.u32 1, %s1012_s24   ;;  %p1344_p7 = scmp.ne.s32.totalorder %s1334_s8, 0 }
 0x2f7   : > { %p1345_p9 = scmp.ge.s32.totalorder %s1024_s27, 2  ;;  %s609_s30 = scalar_lea.sflag [#allocation4], %s608_s29 }
 0x2f9   : > { %p803_p12 = pnand %p1345_p9, %p1344_p7 }
 0x2fb   : > { %1007 = dma.done.wait (!%p803_p12), %s609_s30, 128  }
 0x2fc   : > { %1009 = vsyncadd (!%p803_p12), %s609_s30, 4294967168  ;;  %p21_p2 = scmp.ge.s32.totalorder %s1184_s13, 4   ;;  %s1346_s24 = smov %s1016_s25 }
 0x2fd   : > { %s1347_s25 = smov %s1020_s26  ;;  %s1348_s26 = smov %s1200_s17 }
 0x2fe   : > { %s1349_s27 = smov %s1184_s13  ;;  %23 = sbr.rel (!%p21_p2) target bundleno = 6 (0x6), region = 101 }
 0x305   :  { %614 = vsyncpa [#allocation3], 1 }
 0x306   :  { %616 = vsyncpa [#allocation3 + $0x1], 1 }
 0x307   :  { %617 = vsyncpa [#allocation6], 1 }
 0x308   :  { %618 = vsyncpa [#allocation4], 1 }
 0x309   :  { %620 = vsyncpa [#allocation4 + $0x1], 1 }

</bundles_post_ra>
